<compile_context>
chip_gen: v7x
topology: tpu7x:2x2x1
jax: 0.10.0
libtpu: 0.0.40
codegen_flags: <defaults>
</compile_context>

<pallas_src>
import functools
import math

import jax
import jax.numpy as jnp
from jax import lax
from jax.experimental import pallas as pl
from jax.experimental.pallas import tpu as pltpu

# MXU operand dtype (accumulation is always f32).  Set to jnp.float32 for bit-closer
# parity with the f32 PyTorch reference (small numeric drift accepted per perf review).
MATMUL_DTYPE = jnp.bfloat16

_LN_EPS = 1e-5


# --------------------------------------------------------------------- helpers

def _bytes(shape, dtype):
    return int(math.prod(shape)) * jnp.dtype(dtype).itemsize


def _vmem_limit(estimate_bytes):
    # Explicit scoped-VMEM budget: v5e defaults to 16 MiB which weight-resident fused
    # kernels exceed at realistic H; cap at 64 MiB so the request is valid on v7x too.
    return int(min(64 * 2**20, max(32 * 2**20, estimate_bytes)))


def _row_tile(m):
    """Largest row tile that still leaves >=2 grid steps when possible (v7x megacore)."""
    cands = (1024, 512, 256, 128, 64, 32, 16, 8)
    for t in cands:
        if m % t == 0 and m // t >= 2:
            return t
    for t in cands:
        if m % t == 0:
            return t
    return m


def _col_tile(n):
    """n is padded to a multiple of 128 by the caller; pick an MXU-friendly lane tile."""
    for t in (512, 256, 128):
        if n % t == 0:
            return t
    return n


def _k_tile(k):
    if k <= 1024:
        return k
    for t in (1024, 512, 256, 128):
        if k % t == 0:
            return t
    return k


# ------------------------------------------- fused multi-head attention + Add & Norm

def _mha_addnorm_kernel(lens_ref, xq_ref, xkv_ref, wqkv_ref, bqkv_ref,
                        wo_ref, bo_ref, g_ref, beta_ref, o_ref, ctx_ref,
                        *, num_heads, causal, scale, eps):
    b = pl.program_id(0)
    xq = xq_ref[...]                       # (Sq, H) f32
    xkv = xkv_ref[...]                     # (Sk, H) f32
    sq, h_dim = xq.shape
    sk = xkv.shape[0]
    dh = h_dim // num_heads
    mdt = wqkv_ref.dtype                   # MXU operand dtype (bf16)

    # Hoisted full-width projections from the fused (H, 3H) Q/K/V weight block:
    # three (S,H)x(H,H) matmuls instead of 3*num_heads N=dh slivers.
    q = (jnp.dot(xq.astype(mdt), wqkv_ref[:, 0:h_dim],
                 preferred_element_type=jnp.float32) + bqkv_ref[:, 0:h_dim])
    k = (jnp.dot(xkv.astype(mdt), wqkv_ref[:, h_dim:2 * h_dim],
                 preferred_element_type=jnp.float32) + bqkv_ref[:, h_dim:2 * h_dim])
    v = (jnp.dot(xkv.astype(mdt), wqkv_ref[:, 2 * h_dim:3 * h_dim],
                 preferred_element_type=jnp.float32) + bqkv_ref[:, 2 * h_dim:3 * h_dim])
    q = q.astype(mdt)
    k = k.astype(mdt)
    v = v.astype(mdt)

    # Additive-mask predicate built in-kernel from the scalar-prefetched valid_len.
    valid = lens_ref[b]
    key_pos = lax.broadcasted_iota(jnp.int32, (sq, sk), 1)
    mask = key_pos >= valid
    if causal:
        qry_pos = lax.broadcasted_iota(jnp.int32, (sq, sk), 0)
        mask = jnp.logical_or(mask, key_pos > qry_pos)

    # Per-head scaled-dot-product attention on head slices of the ACTIVATIONS; the
    # head outputs are written into VMEM scratch so the output projection below is a
    # single full-K matmul instead of num_heads K=dh accumulating folds.
    for h in range(num_heads):
        sl = slice(h * dh, (h + 1) * dh)
        s = lax.dot_general(q[:, sl], k[:, sl], (((1,), (1,)), ((), ())),
                            preferred_element_type=jnp.float32) * scale
        s = jnp.where(mask, -1e6, s)
        m = jnp.max(s, axis=-1, keepdims=True)
        p = jnp.exp(s - m)
        denom = jnp.sum(p, axis=-1, keepdims=True)
        p = p * pl.reciprocal(denom, approx=True)
        ctx_ref[:, sl] = jnp.dot(p.astype(mdt), v[:, sl],
                                 preferred_element_type=jnp.float32)

    attn = (jnp.dot(ctx_ref[...].astype(mdt), wo_ref[...],
                    preferred_element_type=jnp.float32) + bo_ref[...])

    # Residual add + LayerNorm (eps matches torch.nn.LayerNorm default), all f32.
    y = xq + attn
    mu = jnp.mean(y, axis=-1, keepdims=True)
    var = jnp.mean(jnp.square(y - mu), axis=-1, keepdims=True)
    out = (y - mu) * lax.rsqrt(var + eps) * g_ref[...] + beta_ref[...]
    o_ref[...] = out.astype(o_ref.dtype)


def mha_addnorm(x_q, x_kv, lens, ap, gamma, beta, num_heads, causal):
    """LayerNorm(x_q + MultiHeadAttention(x_q, x_kv, x_kv)) in a single kernel."""
    B, Sq, H = x_q.shape
    Sk = x_kv.shape[1]
    assert H % num_heads == 0
    dh = H // num_heads
    wqkv, bqkv, wo, bo = ap["wqkv"], ap["bqkv"], ap["wo"], ap["bo"]

    kern = functools.partial(_mha_addnorm_kernel, num_heads=num_heads, causal=causal,
                             scale=1.0 / math.sqrt(dh), eps=_LN_EPS)

    # Grid-invariant weight / bias / LayerNorm blocks (constant block index).
    # TODO(synk): pipeline_mode=pl.Buffered(1) would single-buffer these constant
    #             blocks (halves their VMEM on v7x); left on the default here.
    wqkv_spec = pl.BlockSpec((H, 3 * H), lambda b, lens: (0, 0))
    wo_spec = pl.BlockSpec((H, H), lambda b, lens: (0, 0))
    b3_spec = pl.BlockSpec((1, 3 * H), lambda b, lens: (0, 0))
    b1_spec = pl.BlockSpec((1, H), lambda b, lens: (0, 0))

    est = (2 * (_bytes((Sq, H), jnp.float32) * 2            # xq block + out block
                + _bytes((Sk, H), jnp.float32)               # xkv block
                + _bytes((H, 3 * H), wqkv.dtype) + _bytes((H, H), wo.dtype)
                + _bytes((1, 3 * H), jnp.float32) + 3 * _bytes((1, H), jnp.float32))
           + _bytes((Sq, H), jnp.float32)                    # ctx scratch
           + 8 * _bytes((Sq, Sk), jnp.float32)               # live scores / softmax temps
           + 4 * 2**20)                                      # headroom

    grid_spec = pltpu.PrefetchScalarGridSpec(
        num_scalar_prefetch=1,
        grid=(B,),
        in_specs=[
            pl.BlockSpec((pl.Squeezed(), Sq, H), lambda b, lens: (b, 0, 0)),   # query side
            pl.BlockSpec((pl.Squeezed(), Sk, H), lambda b, lens: (b, 0, 0)),   # key/value side
            wqkv_spec, b3_spec,      # fused Wqkv, bqkv
            wo_spec, b1_spec,        # Wo, bo
            b1_spec, b1_spec,        # gamma, beta
        ],
        out_specs=pl.BlockSpec((pl.Squeezed(), Sq, H), lambda b, lens: (b, 0, 0)),
        scratch_shapes=[pltpu.VMEM((Sq, H), jnp.float32)],
    )
    return pl.pallas_call(
        kern,
        grid_spec=grid_spec,
        out_shape=jax.ShapeDtypeStruct((B, Sq, H), jnp.float32),
        compiler_params=pltpu.CompilerParams(
            dimension_semantics=("parallel",),
            vmem_limit_bytes=_vmem_limit(est)),
    )(lens.astype(jnp.int32), x_q, x_kv,
      wqkv, bqkv.reshape(1, 3 * H), wo, bo.reshape(1, H),
      gamma.reshape(1, H), beta.reshape(1, H))


# ----------------------------------------------------- fused FFN + Add & Norm kernel

def _ffn_addnorm_kernel(x_ref, w1_ref, b1_ref, w2_ref, b2_ref, g_ref, beta_ref, o_ref,
                        *, eps):
    x = x_ref[...]
    mdt = w1_ref.dtype
    h = jnp.maximum(
        jnp.dot(x.astype(mdt), w1_ref[...], preferred_element_type=jnp.float32)
        + b1_ref[...], 0.0)
    f = (jnp.dot(h.astype(mdt), w2_ref[...], preferred_element_type=jnp.float32)
         + b2_ref[...])
    y = x + f
    mu = jnp.mean(y, axis=-1, keepdims=True)
    var = jnp.mean(jnp.square(y - mu), axis=-1, keepdims=True)
    out = (y - mu) * lax.rsqrt(var + eps) * g_ref[...] + beta_ref[...]
    o_ref[...] = out.astype(o_ref.dtype)


def ffn_addnorm(x2d, w1, b1, w2, b2, gamma, beta):
    """LayerNorm(x + ReLU(x@W1+b1)@W2+b2), x2d: (M, H)."""
    M, H = x2d.shape
    F = w1.shape[1]
    tm = _row_tile(M)
    est = (2 * (2 * _bytes((tm, H), jnp.float32)
                + _bytes((H, F), w1.dtype) + _bytes((F, H), w2.dtype)
                + _bytes((1, F), jnp.float32) + 3 * _bytes((1, H), jnp.float32))
           + 2 * _bytes((tm, F), jnp.float32) + 4 * 2**20)
    return pl.pallas_call(
        functools.partial(_ffn_addnorm_kernel, eps=_LN_EPS),
        grid=(M // tm,),
        in_specs=[
            pl.BlockSpec((tm, H), lambda i: (i, 0)),
            pl.BlockSpec((H, F), lambda i: (0, 0)),
            pl.BlockSpec((1, F), lambda i: (0, 0)),
            pl.BlockSpec((F, H), lambda i: (0, 0)),
            pl.BlockSpec((1, H), lambda i: (0, 0)),
            pl.BlockSpec((1, H), lambda i: (0, 0)),
            pl.BlockSpec((1, H), lambda i: (0, 0)),
        ],
        out_specs=pl.BlockSpec((tm, H), lambda i: (i, 0)),
        out_shape=jax.ShapeDtypeStruct((M, H), jnp.float32),
        compiler_params=pltpu.CompilerParams(
            dimension_semantics=("parallel",),
            vmem_limit_bytes=_vmem_limit(est)),
    )(x2d, w1, b1.reshape(1, F), w2, b2.reshape(1, H),
      gamma.reshape(1, H), beta.reshape(1, H))


# --------------------------------------------------- tiled linear (logits projection)

def _matmul_bias_kernel(x_ref, w_ref, b_ref, o_ref, acc_ref):
    @pl.when(pl.program_id(2) == 0)
    def _():
        acc_ref[...] = jnp.zeros_like(acc_ref)

    acc_ref[...] += jnp.dot(x_ref[...], w_ref[...], preferred_element_type=jnp.float32)

    @pl.when(pl.program_id(2) == pl.num_programs(2) - 1)
    def _():
        o_ref[...] = (acc_ref[...] + b_ref[...]).astype(o_ref.dtype)


def linear(x2d, w, b):
    """y = x @ W + b, tiled over (M, N, K).  The N (vocab) axis is padded to a
    lane-dense multiple of 128 so output stores are unmasked vst, then sliced back."""
    M, K = x2d.shape
    N = w.shape[1]
    n_pad = (-N) % 128
    if n_pad:
        w = jnp.pad(w, ((0, 0), (0, n_pad)))
        b = jnp.pad(b, ((0, n_pad),))
    Np = N + n_pad
    tm, tn, tk = _row_tile(M), _col_tile(Np), _k_tile(K)
    x2d = x2d.astype(w.dtype)            # bf16 MXU operands, f32 accumulation
    out = pl.pallas_call(
        _matmul_bias_kernel,
        grid=(M // tm, Np // tn, K // tk),
        in_specs=[
            pl.BlockSpec((tm, tk), lambda i, j, k: (i, k)),
            pl.BlockSpec((tk, tn), lambda i, j, k: (k, j)),
            pl.BlockSpec((1, tn), lambda i, j, k: (0, j)),
        ],
        out_specs=pl.BlockSpec((tm, tn), lambda i, j, k: (i, j)),
        out_shape=jax.ShapeDtypeStruct((M, Np), jnp.float32),
        scratch_shapes=[pltpu.VMEM((tm, tn), jnp.float32)],
        compiler_params=pltpu.CompilerParams(
            dimension_semantics=("parallel", "parallel", "arbitrary")),
    )(x2d, w, b.reshape(1, Np))
    return out[:, :N] if n_pad else out


# ------------------------------------------------------------------------ model pieces

def encoder_block(p, x, enc_lens, num_heads):
    B, S, H = x.shape
    x = mha_addnorm(x, x, enc_lens, p["attn"], p["ln1_g"], p["ln1_b"],
                    num_heads, causal=False)
    x = ffn_addnorm(x.reshape(B * S, H), p["ffn_w1"], p["ffn_b1"],
                    p["ffn_w2"], p["ffn_b2"], p["ln2_g"], p["ln2_b"]).reshape(B, S, H)
    return x


def decoder_block(p, x, enc_out, dec_lens, enc_lens, num_heads):
    B, S, H = x.shape
    x = mha_addnorm(x, x, dec_lens, p["self_attn"], p["ln1_g"], p["ln1_b"],
                    num_heads, causal=True)
    x = mha_addnorm(x, enc_out, enc_lens, p["cross_attn"], p["ln2_g"], p["ln2_b"],
                    num_heads, causal=False)
    x = ffn_addnorm(x.reshape(B * S, H), p["ffn_w1"], p["ffn_b1"],
                    p["ffn_w2"], p["ffn_b2"], p["ln3_g"], p["ln3_b"]).reshape(B, S, H)
    return x


def positional_encoding(max_len, d):
    pos = jnp.arange(max_len, dtype=jnp.float32)[:, None]
    i = jnp.arange(0, d, 2, dtype=jnp.float32)[None, :]
    angle = pos / jnp.power(10000.0, i / d)
    pe = jnp.zeros((max_len, d), jnp.float32)
    pe = pe.at[:, 0::2].set(jnp.sin(angle))
    pe = pe.at[:, 1::2].set(jnp.cos(angle))
    return pe


def encoder_decoder_forward(params, encoder_input, decoder_input,
                            encoder_valid_lens=None, decoder_valid_lens=None):
    cfg = params["cfg"]
    H, nh = cfg["num_hidden"], cfg["num_heads"]
    B, Se = encoder_input.shape
    _, Sd = decoder_input.shape
    pe = params["pos_enc"]

    enc_lens = (encoder_valid_lens.astype(jnp.int32) if encoder_valid_lens is not None
                else jnp.full((B,), Se, jnp.int32))
    dec_lens = (decoder_valid_lens.astype(jnp.int32) if decoder_valid_lens is not None
                else jnp.full((B,), Sd, jnp.int32))

    # ---- Encoder ----
    x = params["enc_embed"][encoder_input] * math.sqrt(H) + pe[:Se][None]
    # TODO(synk): dropout(p=0.1) layers omitted — eval-mode (deterministic) forward.
    for blk in params["enc_blocks"]:
        x = encoder_block(blk, x, enc_lens, nh)
    enc_out = x

    # ---- Decoder (init_state just carries enc_out + enc_valid_lens) ----
    y = params["dec_embed"][decoder_input] * math.sqrt(H) + pe[:Sd][None]
    for blk in params["dec_blocks"]:
        y = decoder_block(blk, y, enc_out, dec_lens, enc_lens, nh)

    logits = linear(y.reshape(B * Sd, H), params["out_w"], params["out_b"])
    return logits.reshape(B, Sd, -1)


# ------------------------------------------------------------------------ params

def init_params(key, embed_dim, num_hidden, ffn_hidden, num_heads, num_blocks,
                src_vocab, tgt_vocab, max_length):
    # Residual connections require embed_dim == num_hidden (model dim).
    assert embed_dim == num_hidden
    H, F = num_hidden, ffn_hidden
    kit = iter(jax.random.split(key, 512))

    def dense(i, o, dtype=jnp.float32):
        return (jax.random.normal(next(kit), (i, o), jnp.float32) * 0.02).astype(dtype)

    def attn():
        # Fused (H, 3H) Q/K/V weight -> one DMA / double-buffer pair per kernel call.
        return dict(wqkv=dense(H, 3 * H, MATMUL_DTYPE),
                    bqkv=jnp.zeros((3 * H,), jnp.float32),
                    wo=dense(H, H, MATMUL_DTYPE),
                    bo=jnp.zeros((H,), jnp.float32))

    def ffn():
        return dict(ffn_w1=dense(H, F, MATMUL_DTYPE), ffn_b1=jnp.zeros((F,), jnp.float32),
                    ffn_w2=dense(F, H, MATMUL_DTYPE), ffn_b2=jnp.zeros((H,), jnp.float32))

    def ln():
        return jnp.ones((H,), jnp.float32), jnp.zeros((H,), jnp.float32)

    enc_blocks, dec_blocks = [], []
    for _ in range(num_blocks):
        g1, b1 = ln(); g2, b2 = ln()
        enc_blocks.append(dict(attn=attn(), ln1_g=g1, ln1_b=b1, ln2_g=g2, ln2_b=b2, **ffn()))
    for _ in range(num_blocks):
        g1, b1 = ln(); g2, b2 = ln(); g3, b3 = ln()
        dec_blocks.append(dict(self_attn=attn(), cross_attn=attn(),
                               ln1_g=g1, ln1_b=b1, ln2_g=g2, ln2_b=b2,
                               ln3_g=g3, ln3_b=b3, **ffn()))

    return dict(
        cfg=dict(num_hidden=H, num_heads=num_heads),
        enc_embed=dense(src_vocab, H) * 50.0,   # ~N(0,1)-scale embeddings, f32
        dec_embed=dense(tgt_vocab, H) * 50.0,
        pos_enc=positional_encoding(max_length, H),
        enc_blocks=enc_blocks,
        dec_blocks=dec_blocks,
        out_w=dense(H, tgt_vocab, MATMUL_DTYPE),
        out_b=jnp.zeros((tgt_vocab,), jnp.float32),
    )


# ------------------------------------------------------------------------ main

if __name__ == "__main__":
    key = jax.random.PRNGKey(0)
    B, Se, Sd = 2, 8, 8
    embed_dim = num_hidden = 32
    ffn_hidden = 64
    num_heads = 4
    num_blocks = 2
    src_vocab, tgt_vocab = 50, 50
    max_length = 1000

    kp, ke, kd = jax.random.split(key, 3)
    params = init_params(kp, embed_dim, num_hidden, ffn_hidden, num_heads,
                         num_blocks, src_vocab, tgt_vocab, max_length)

    encoder_input = jax.random.randint(ke, (B, Se), 0, src_vocab, dtype=jnp.int32)
    decoder_input = jax.random.randint(kd, (B, Sd), 0, tgt_vocab, dtype=jnp.int32)
    encoder_valid_lens = jnp.array([Se, 5], dtype=jnp.int32)

    out = encoder_decoder_forward(params, encoder_input, decoder_input,
                                  encoder_valid_lens=encoder_valid_lens,
                                  decoder_valid_lens=None)
    out = jax.block_until_ready(out)
    assert out.shape == (B, Sd, tgt_vocab) and out.dtype == jnp.float32
    assert bool(jnp.all(jnp.isfinite(out)))
    print("KERNEL_OK")
</pallas_src>

<mosaic_0001>
module attributes {stable_mosaic.version = 11 : i64} {
  func.func @_mha_addnorm_kernel(%arg0: i32, %arg1: memref<2xi32, #tpu.memory_space<smem>>, %arg2: memref<1x8x32xf32, #tpu.memory_space<vmem>>, %arg3: memref<1x8x32xf32, #tpu.memory_space<vmem>>, %arg4: memref<32x96xbf16, #tpu.memory_space<vmem>>, %arg5: memref<1x96xf32, #tpu.memory_space<vmem>>, %arg6: memref<32x32xbf16, #tpu.memory_space<vmem>>, %arg7: memref<1x32xf32, #tpu.memory_space<vmem>>, %arg8: memref<1x32xf32, #tpu.memory_space<vmem>>, %arg9: memref<1x32xf32, #tpu.memory_space<vmem>>, %arg10: memref<1x8x32xf32, #tpu.memory_space<vmem>>, %arg11: memref<8x32xf32, #tpu.memory_space<vmem>>) attributes {dimension_semantics = [#tpu.dimension_semantics<parallel>], iteration_bounds = array<i64: 2>, scalar_prefetch = 1 : i64, scratch_operands = 1 : i64, tpu.core_type = #tpu.core_type<tc>, window_params = [{transform_indices = @transform_0, window_bounds = array<i64: 1, 8, 32>}, {transform_indices = @transform_1, window_bounds = array<i64: 1, 8, 32>}, {pipeline_mode = #tpu.pipeline_mode<synchronous>, transform_indices = @transform_2, window_bounds = array<i64: 32, 96>}, {pipeline_mode = #tpu.pipeline_mode<synchronous>, transform_indices = @transform_3, window_bounds = array<i64: 1, 96>}, {pipeline_mode = #tpu.pipeline_mode<synchronous>, transform_indices = @transform_4, window_bounds = array<i64: 32, 32>}, {pipeline_mode = #tpu.pipeline_mode<synchronous>, transform_indices = @transform_5, window_bounds = array<i64: 1, 32>}, {pipeline_mode = #tpu.pipeline_mode<synchronous>, transform_indices = @transform_6, window_bounds = array<i64: 1, 32>}, {pipeline_mode = #tpu.pipeline_mode<synchronous>, transform_indices = @transform_7, window_bounds = array<i64: 1, 32>}, {transform_indices = @transform_8, window_bounds = array<i64: 1, 8, 32>}]} {
    %c0 = arith.constant 0 : index
    %c0_0 = arith.constant 0 : index
    %c0_1 = arith.constant 0 : index
    %0 = vector.load %arg2[%c0, %c0_0, %c0_1] : memref<1x8x32xf32, #tpu.memory_space<vmem>>, vector<1x8x32xf32>
    %1 = vector.shape_cast %0 : vector<1x8x32xf32> to vector<8x32xf32>
    %c0_2 = arith.constant 0 : index
    %c0_3 = arith.constant 0 : index
    %c0_4 = arith.constant 0 : index
    %2 = vector.load %arg3[%c0_2, %c0_3, %c0_4] : memref<1x8x32xf32, #tpu.memory_space<vmem>>, vector<1x8x32xf32>
    %3 = vector.shape_cast %2 : vector<1x8x32xf32> to vector<8x32xf32>
    %4 = arith.truncf %1 : vector<8x32xf32> to vector<8x32xbf16>
    %c0_5 = arith.constant 0 : index
    %c0_6 = arith.constant 0 : index
    %5 = vector.load %arg4[%c0_5, %c0_6] : memref<32x96xbf16, #tpu.memory_space<vmem>>, vector<32x32xbf16>
    %cst = arith.constant dense<0.000000e+00> : vector<8x32xf32>
    %6 = tpu.matmul %4, %5, %cst {dimension_numbers = #tpu.dot_dimension_numbers<[1], [0], [0], [1], [0, 0, 1, 1], [], []>} : vector<8x32xbf16>, vector<32x32xbf16>, vector<8x32xf32> -> vector<8x32xf32>
    %c0_7 = arith.constant 0 : index
    %c0_8 = arith.constant 0 : index
    %7 = vector.load %arg5[%c0_7, %c0_8] : memref<1x96xf32, #tpu.memory_space<vmem>>, vector<1x32xf32>
    %8 = vector.broadcast %7 : vector<1x32xf32> to vector<8x32xf32>
    %9 = arith.addf %6, %8 : vector<8x32xf32>
    %10 = arith.truncf %3 : vector<8x32xf32> to vector<8x32xbf16>
    %c0_9 = arith.constant 0 : index
    %c32 = arith.constant 32 : index
    %11 = vector.load %arg4[%c0_9, %c32] : memref<32x96xbf16, #tpu.memory_space<vmem>>, vector<32x32xbf16>
    %cst_10 = arith.constant dense<0.000000e+00> : vector<8x32xf32>
    %12 = tpu.matmul %10, %11, %cst_10 {dimension_numbers = #tpu.dot_dimension_numbers<[1], [0], [0], [1], [0, 0, 1, 1], [], []>} : vector<8x32xbf16>, vector<32x32xbf16>, vector<8x32xf32> -> vector<8x32xf32>
    %c0_11 = arith.constant 0 : index
    %c32_12 = arith.constant 32 : index
    %13 = vector.load %arg5[%c0_11, %c32_12] : memref<1x96xf32, #tpu.memory_space<vmem>>, vector<1x32xf32>
    %14 = vector.broadcast %13 : vector<1x32xf32> to vector<8x32xf32>
    %15 = arith.addf %12, %14 : vector<8x32xf32>
    %16 = arith.truncf %3 : vector<8x32xf32> to vector<8x32xbf16>
    %c0_13 = arith.constant 0 : index
    %c64 = arith.constant 64 : index
    %17 = vector.load %arg4[%c0_13, %c64] : memref<32x96xbf16, #tpu.memory_space<vmem>>, vector<32x32xbf16>
    %cst_14 = arith.constant dense<0.000000e+00> : vector<8x32xf32>
    %18 = tpu.matmul %16, %17, %cst_14 {dimension_numbers = #tpu.dot_dimension_numbers<[1], [0], [0], [1], [0, 0, 1, 1], [], []>} : vector<8x32xbf16>, vector<32x32xbf16>, vector<8x32xf32> -> vector<8x32xf32>
    %c0_15 = arith.constant 0 : index
    %c64_16 = arith.constant 64 : index
    %19 = vector.load %arg5[%c0_15, %c64_16] : memref<1x96xf32, #tpu.memory_space<vmem>>, vector<1x32xf32>
    %20 = vector.broadcast %19 : vector<1x32xf32> to vector<8x32xf32>
    %21 = arith.addf %18, %20 : vector<8x32xf32>
    %22 = arith.truncf %9 : vector<8x32xf32> to vector<8x32xbf16>
    %23 = arith.truncf %15 : vector<8x32xf32> to vector<8x32xbf16>
    %24 = arith.truncf %21 : vector<8x32xf32> to vector<8x32xbf16>
    %25 = arith.index_cast %arg0 : i32 to index
    %26 = memref.load %arg1[%25] : memref<2xi32, #tpu.memory_space<smem>>
    %27 = tpu.iota {dimensions = array<i32: 1>} : vector<8x8xi32>
    %28 = vector.broadcast %26 : i32 to vector<8x8xi32>
    %29 = arith.cmpi sge, %27, %28 : vector<8x8xi32>
    %30 = vector.extract_strided_slice %22 {offsets = [0, 0], sizes = [8, 8], strides = [1, 1]} : vector<8x32xbf16> to vector<8x8xbf16>
    %31 = vector.extract_strided_slice %23 {offsets = [0, 0], sizes = [8, 8], strides = [1, 1]} : vector<8x32xbf16> to vector<8x8xbf16>
    %cst_17 = arith.constant dense<0.000000e+00> : vector<8x8xf32>
    %32 = tpu.matmul %30, %31, %cst_17 {dimension_numbers = #tpu.dot_dimension_numbers<[1], [1], [0], [0], [0, 0, 1, 0], [], []>} : vector<8x8xbf16>, vector<8x8xbf16>, vector<8x8xf32> -> vector<8x8xf32>
    %cst_18 = arith.constant 0.353553385 : f32
    %33 = vector.broadcast %cst_18 : f32 to vector<8x8xf32>
    %34 = arith.mulf %32, %33 : vector<8x8xf32>
    %cst_19 = arith.constant -1.000000e+06 : f32
    %35 = vector.broadcast %cst_19 : f32 to vector<8x8xf32>
    %36 = arith.select %29, %35, %34 : vector<8x8xi1>, vector<8x8xf32>
    %cst_20 = arith.constant dense<0xFF800000> : vector<8xf32>
    %37 = vector.multi_reduction <maximumf>, %36, %cst_20 [1] : vector<8x8xf32> to vector<8xf32>
    %38 = vector.shape_cast %37 : vector<8xf32> to vector<8x1xf32>
    %39 = vector.broadcast %38 : vector<8x1xf32> to vector<8x8xf32>
    %40 = arith.subf %36, %39 : vector<8x8xf32>
    %41 = math.exp %40 : vector<8x8xf32>
    %cst_21 = arith.constant dense<0.000000e+00> : vector<8xf32>
    %42 = vector.multi_reduction <add>, %41, %cst_21 [1] : vector<8x8xf32> to vector<8xf32>
    %43 = vector.shape_cast %42 : vector<8xf32> to vector<8x1xf32>
    %44 = tpu.reciprocal %43 {approx = true} : vector<8x1xf32> -> vector<8x1xf32>
    %45 = vector.broadcast %44 : vector<8x1xf32> to vector<8x8xf32>
    %46 = arith.mulf %41, %45 : vector<8x8xf32>
    %47 = arith.truncf %46 : vector<8x8xf32> to vector<8x8xbf16>
    %48 = vector.extract_strided_slice %24 {offsets = [0, 0], sizes = [8, 8], strides = [1, 1]} : vector<8x32xbf16> to vector<8x8xbf16>
    %cst_22 = arith.constant dense<0.000000e+00> : vector<8x8xf32>
    %49 = tpu.matmul %47, %48, %cst_22 {dimension_numbers = #tpu.dot_dimension_numbers<[1], [0], [0], [1], [0, 0, 1, 1], [], []>} : vector<8x8xbf16>, vector<8x8xbf16>, vector<8x8xf32> -> vector<8x8xf32>
    %c0_23 = arith.constant 0 : index
    %c0_24 = arith.constant 0 : index
    %50 = vector.load %arg11[%c0_23, %c0_24] : memref<8x32xf32, #tpu.memory_space<vmem>>, vector<8x8xf32>
    tpu.vector_store %arg11[%c0_23, %c0_24], %49 {strides = array<i32>} : memref<8x32xf32, #tpu.memory_space<vmem>>, vector<8x8xf32>,
    %51 = vector.extract_strided_slice %22 {offsets = [0, 8], sizes = [8, 8], strides = [1, 1]} : vector<8x32xbf16> to vector<8x8xbf16>
    %52 = vector.extract_strided_slice %23 {offsets = [0, 8], sizes = [8, 8], strides = [1, 1]} : vector<8x32xbf16> to vector<8x8xbf16>
    %cst_25 = arith.constant dense<0.000000e+00> : vector<8x8xf32>
    %53 = tpu.matmul %51, %52, %cst_25 {dimension_numbers = #tpu.dot_dimension_numbers<[1], [1], [0], [0], [0, 0, 1, 0], [], []>} : vector<8x8xbf16>, vector<8x8xbf16>, vector<8x8xf32> -> vector<8x8xf32>
    %cst_26 = arith.constant 0.353553385 : f32
    %54 = vector.broadcast %cst_26 : f32 to vector<8x8xf32>
    %55 = arith.mulf %53, %54 : vector<8x8xf32>
    %cst_27 = arith.constant -1.000000e+06 : f32
    %56 = vector.broadcast %cst_27 : f32 to vector<8x8xf32>
    %57 = arith.select %29, %56, %55 : vector<8x8xi1>, vector<8x8xf32>
    %cst_28 = arith.constant dense<0xFF800000> : vector<8xf32>
    %58 = vector.multi_reduction <maximumf>, %57, %cst_28 [1] : vector<8x8xf32> to vector<8xf32>
    %59 = vector.shape_cast %58 : vector<8xf32> to vector<8x1xf32>
    %60 = vector.broadcast %59 : vector<8x1xf32> to vector<8x8xf32>
    %61 = arith.subf %57, %60 : vector<8x8xf32>
    %62 = math.exp %61 : vector<8x8xf32>
    %cst_29 = arith.constant dense<0.000000e+00> : vector<8xf32>
    %63 = vector.multi_reduction <add>, %62, %cst_29 [1] : vector<8x8xf32> to vector<8xf32>
    %64 = vector.shape_cast %63 : vector<8xf32> to vector<8x1xf32>
    %65 = tpu.reciprocal %64 {approx = true} : vector<8x1xf32> -> vector<8x1xf32>
    %66 = vector.broadcast %65 : vector<8x1xf32> to vector<8x8xf32>
    %67 = arith.mulf %62, %66 : vector<8x8xf32>
    %68 = arith.truncf %67 : vector<8x8xf32> to vector<8x8xbf16>
    %69 = vector.extract_strided_slice %24 {offsets = [0, 8], sizes = [8, 8], strides = [1, 1]} : vector<8x32xbf16> to vector<8x8xbf16>
    %cst_30 = arith.constant dense<0.000000e+00> : vector<8x8xf32>
    %70 = tpu.matmul %68, %69, %cst_30 {dimension_numbers = #tpu.dot_dimension_numbers<[1], [0], [0], [1], [0, 0, 1, 1], [], []>} : vector<8x8xbf16>, vector<8x8xbf16>, vector<8x8xf32> -> vector<8x8xf32>
    %c0_31 = arith.constant 0 : index
    %c8 = arith.constant 8 : index
    %71 = vector.load %arg11[%c0_31, %c8] : memref<8x32xf32, #tpu.memory_space<vmem>>, vector<8x8xf32>
    tpu.vector_store %arg11[%c0_31, %c8], %70 {strides = array<i32>} : memref<8x32xf32, #tpu.memory_space<vmem>>, vector<8x8xf32>,
    %72 = vector.extract_strided_slice %22 {offsets = [0, 16], sizes = [8, 8], strides = [1, 1]} : vector<8x32xbf16> to vector<8x8xbf16>
    %73 = vector.extract_strided_slice %23 {offsets = [0, 16], sizes = [8, 8], strides = [1, 1]} : vector<8x32xbf16> to vector<8x8xbf16>
    %cst_32 = arith.constant dense<0.000000e+00> : vector<8x8xf32>
    %74 = tpu.matmul %72, %73, %cst_32 {dimension_numbers = #tpu.dot_dimension_numbers<[1], [1], [0], [0], [0, 0, 1, 0], [], []>} : vector<8x8xbf16>, vector<8x8xbf16>, vector<8x8xf32> -> vector<8x8xf32>
    %cst_33 = arith.constant 0.353553385 : f32
    %75 = vector.broadcast %cst_33 : f32 to vector<8x8xf32>
    %76 = arith.mulf %74, %75 : vector<8x8xf32>
    %cst_34 = arith.constant -1.000000e+06 : f32
    %77 = vector.broadcast %cst_34 : f32 to vector<8x8xf32>
    %78 = arith.select %29, %77, %76 : vector<8x8xi1>, vector<8x8xf32>
    %cst_35 = arith.constant dense<0xFF800000> : vector<8xf32>
    %79 = vector.multi_reduction <maximumf>, %78, %cst_35 [1] : vector<8x8xf32> to vector<8xf32>
    %80 = vector.shape_cast %79 : vector<8xf32> to vector<8x1xf32>
    %81 = vector.broadcast %80 : vector<8x1xf32> to vector<8x8xf32>
    %82 = arith.subf %78, %81 : vector<8x8xf32>
    %83 = math.exp %82 : vector<8x8xf32>
    %cst_36 = arith.constant dense<0.000000e+00> : vector<8xf32>
    %84 = vector.multi_reduction <add>, %83, %cst_36 [1] : vector<8x8xf32> to vector<8xf32>
    %85 = vector.shape_cast %84 : vector<8xf32> to vector<8x1xf32>
    %86 = tpu.reciprocal %85 {approx = true} : vector<8x1xf32> -> vector<8x1xf32>
    %87 = vector.broadcast %86 : vector<8x1xf32> to vector<8x8xf32>
    %88 = arith.mulf %83, %87 : vector<8x8xf32>
    %89 = arith.truncf %88 : vector<8x8xf32> to vector<8x8xbf16>
    %90 = vector.extract_strided_slice %24 {offsets = [0, 16], sizes = [8, 8], strides = [1, 1]} : vector<8x32xbf16> to vector<8x8xbf16>
    %cst_37 = arith.constant dense<0.000000e+00> : vector<8x8xf32>
    %91 = tpu.matmul %89, %90, %cst_37 {dimension_numbers = #tpu.dot_dimension_numbers<[1], [0], [0], [1], [0, 0, 1, 1], [], []>} : vector<8x8xbf16>, vector<8x8xbf16>, vector<8x8xf32> -> vector<8x8xf32>
    %c0_38 = arith.constant 0 : index
    %c16 = arith.constant 16 : index
    %92 = vector.load %arg11[%c0_38, %c16] : memref<8x32xf32, #tpu.memory_space<vmem>>, vector<8x8xf32>
    tpu.vector_store %arg11[%c0_38, %c16], %91 {strides = array<i32>} : memref<8x32xf32, #tpu.memory_space<vmem>>, vector<8x8xf32>,
    %93 = vector.extract_strided_slice %22 {offsets = [0, 24], sizes = [8, 8], strides = [1, 1]} : vector<8x32xbf16> to vector<8x8xbf16>
    %94 = vector.extract_strided_slice %23 {offsets = [0, 24], sizes = [8, 8], strides = [1, 1]} : vector<8x32xbf16> to vector<8x8xbf16>
    %cst_39 = arith.constant dense<0.000000e+00> : vector<8x8xf32>
    %95 = tpu.matmul %93, %94, %cst_39 {dimension_numbers = #tpu.dot_dimension_numbers<[1], [1], [0], [0], [0, 0, 1, 0], [], []>} : vector<8x8xbf16>, vector<8x8xbf16>, vector<8x8xf32> -> vector<8x8xf32>
    %cst_40 = arith.constant 0.353553385 : f32
    %96 = vector.broadcast %cst_40 : f32 to vector<8x8xf32>
    %97 = arith.mulf %95, %96 : vector<8x8xf32>
    %cst_41 = arith.constant -1.000000e+06 : f32
    %98 = vector.broadcast %cst_41 : f32 to vector<8x8xf32>
    %99 = arith.select %29, %98, %97 : vector<8x8xi1>, vector<8x8xf32>
    %cst_42 = arith.constant dense<0xFF800000> : vector<8xf32>
    %100 = vector.multi_reduction <maximumf>, %99, %cst_42 [1] : vector<8x8xf32> to vector<8xf32>
    %101 = vector.shape_cast %100 : vector<8xf32> to vector<8x1xf32>
    %102 = vector.broadcast %101 : vector<8x1xf32> to vector<8x8xf32>
    %103 = arith.subf %99, %102 : vector<8x8xf32>
    %104 = math.exp %103 : vector<8x8xf32>
    %cst_43 = arith.constant dense<0.000000e+00> : vector<8xf32>
    %105 = vector.multi_reduction <add>, %104, %cst_43 [1] : vector<8x8xf32> to vector<8xf32>
    %106 = vector.shape_cast %105 : vector<8xf32> to vector<8x1xf32>
    %107 = tpu.reciprocal %106 {approx = true} : vector<8x1xf32> -> vector<8x1xf32>
    %108 = vector.broadcast %107 : vector<8x1xf32> to vector<8x8xf32>
    %109 = arith.mulf %104, %108 : vector<8x8xf32>
    %110 = arith.truncf %109 : vector<8x8xf32> to vector<8x8xbf16>
    %111 = vector.extract_strided_slice %24 {offsets = [0, 24], sizes = [8, 8], strides = [1, 1]} : vector<8x32xbf16> to vector<8x8xbf16>
    %cst_44 = arith.constant dense<0.000000e+00> : vector<8x8xf32>
    %112 = tpu.matmul %110, %111, %cst_44 {dimension_numbers = #tpu.dot_dimension_numbers<[1], [0], [0], [1], [0, 0, 1, 1], [], []>} : vector<8x8xbf16>, vector<8x8xbf16>, vector<8x8xf32> -> vector<8x8xf32>
    %c0_45 = arith.constant 0 : index
    %c24 = arith.constant 24 : index
    %113 = vector.load %arg11[%c0_45, %c24] : memref<8x32xf32, #tpu.memory_space<vmem>>, vector<8x8xf32>
    tpu.vector_store %arg11[%c0_45, %c24], %112 {strides = array<i32>} : memref<8x32xf32, #tpu.memory_space<vmem>>, vector<8x8xf32>,
    %c0_46 = arith.constant 0 : index
    %c0_47 = arith.constant 0 : index
    %114 = vector.load %arg11[%c0_46, %c0_47] : memref<8x32xf32, #tpu.memory_space<vmem>>, vector<8x32xf32>
    %115 = arith.truncf %114 : vector<8x32xf32> to vector<8x32xbf16>
    %c0_48 = arith.constant 0 : index
    %c0_49 = arith.constant 0 : index
    %116 = vector.load %arg6[%c0_48, %c0_49] : memref<32x32xbf16, #tpu.memory_space<vmem>>, vector<32x32xbf16>
    %cst_50 = arith.constant dense<0.000000e+00> : vector<8x32xf32>
    %117 = tpu.matmul %115, %116, %cst_50 {dimension_numbers = #tpu.dot_dimension_numbers<[1], [0], [0], [1], [0, 0, 1, 1], [], []>} : vector<8x32xbf16>, vector<32x32xbf16>, vector<8x32xf32> -> vector<8x32xf32>
    %c0_51 = arith.constant 0 : index
    %c0_52 = arith.constant 0 : index
    %118 = vector.load %arg7[%c0_51, %c0_52] : memref<1x32xf32, #tpu.memory_space<vmem>>, vector<1x32xf32>
    %119 = vector.broadcast %118 : vector<1x32xf32> to vector<8x32xf32>
    %120 = arith.addf %117, %119 : vector<8x32xf32>
    %121 = arith.addf %1, %120 : vector<8x32xf32>
    %cst_53 = arith.constant dense<0.000000e+00> : vector<8xf32>
    %122 = vector.multi_reduction <add>, %121, %cst_53 [1] : vector<8x32xf32> to vector<8xf32>
    %123 = vector.shape_cast %122 : vector<8xf32> to vector<8x1xf32>
    %cst_54 = arith.constant 3.200000e+01 : f32
    %124 = vector.broadcast %cst_54 : f32 to vector<8x1xf32>
    %125 = arith.divf %123, %124 : vector<8x1xf32>
    %126 = vector.broadcast %125 : vector<8x1xf32> to vector<8x32xf32>
    %127 = arith.subf %121, %126 : vector<8x32xf32>
    %128 = arith.mulf %127, %127 : vector<8x32xf32>
    %cst_55 = arith.constant dense<0.000000e+00> : vector<8xf32>
    %129 = vector.multi_reduction <add>, %128, %cst_55 [1] : vector<8x32xf32> to vector<8xf32>
    %130 = vector.shape_cast %129 : vector<8xf32> to vector<8x1xf32>
    %cst_56 = arith.constant 3.200000e+01 : f32
    %131 = vector.broadcast %cst_56 : f32 to vector<8x1xf32>
    %132 = arith.divf %130, %131 : vector<8x1xf32>
    %133 = vector.broadcast %125 : vector<8x1xf32> to vector<8x32xf32>
    %134 = arith.subf %121, %133 : vector<8x32xf32>
    %cst_57 = arith.constant 9.99999974E-6 : f32
    %135 = vector.broadcast %cst_57 : f32 to vector<8x1xf32>
    %136 = arith.addf %132, %135 : vector<8x1xf32>
    %137 = math.rsqrt %136 : vector<8x1xf32>
    %138 = vector.broadcast %137 : vector<8x1xf32> to vector<8x32xf32>
    %139 = arith.mulf %134, %138 : vector<8x32xf32>
    %c0_58 = arith.constant 0 : index
    %c0_59 = arith.constant 0 : index
    %140 = vector.load %arg8[%c0_58, %c0_59] : memref<1x32xf32, #tpu.memory_space<vmem>>, vector<1x32xf32>
    %141 = vector.broadcast %140 : vector<1x32xf32> to vector<8x32xf32>
    %142 = arith.mulf %139, %141 : vector<8x32xf32>
    %c0_60 = arith.constant 0 : index
    %c0_61 = arith.constant 0 : index
    %143 = vector.load %arg9[%c0_60, %c0_61] : memref<1x32xf32, #tpu.memory_space<vmem>>, vector<1x32xf32>
    %144 = vector.broadcast %143 : vector<1x32xf32> to vector<8x32xf32>
    %145 = arith.addf %142, %144 : vector<8x32xf32>
    %c0_62 = arith.constant 0 : index
    %c0_63 = arith.constant 0 : index
    %c0_64 = arith.constant 0 : index
    %146 = vector.load %arg10[%c0_62, %c0_63, %c0_64] : memref<1x8x32xf32, #tpu.memory_space<vmem>>, vector<1x8x32xf32>
    %147 = vector.shape_cast %146 : vector<1x8x32xf32> to vector<8x32xf32>
    %148 = vector.shape_cast %145 : vector<8x32xf32> to vector<1x8x32xf32>
    tpu.vector_store %arg10[%c0_62, %c0_63, %c0_64], %148 {strides = array<i32>} : memref<1x8x32xf32, #tpu.memory_space<vmem>>, vector<1x8x32xf32>,
    return
  }
  func.func @transform_0(%arg0: i32, %arg1: memref<2xi32, #tpu.memory_space<smem>>) -> (i32, i32, i32) {
    %c0_i32 = arith.constant 0 : i32
    %c0_i32_0 = arith.constant 0 : i32
    %c0_i32_1 = arith.constant 0 : i32
    return %arg0, %c0_i32, %c0_i32_0 : i32, i32, i32
  }
  func.func @transform_1(%arg0: i32, %arg1: memref<2xi32, #tpu.memory_space<smem>>) -> (i32, i32, i32) {
    %c0_i32 = arith.constant 0 : i32
    %c0_i32_0 = arith.constant 0 : i32
    %c0_i32_1 = arith.constant 0 : i32
    return %arg0, %c0_i32, %c0_i32_0 : i32, i32, i32
  }
  func.func @transform_2(%arg0: i32, %arg1: memref<2xi32, #tpu.memory_space<smem>>) -> (i32, i32) {
    %c0_i32 = arith.constant 0 : i32
    %c0_i32_0 = arith.constant 0 : i32
    %c0_i32_1 = arith.constant 0 : i32
    return %c0_i32, %c0_i32_0 : i32, i32
  }
  func.func @transform_3(%arg0: i32, %arg1: memref<2xi32, #tpu.memory_space<smem>>) -> (i32, i32) {
    %c0_i32 = arith.constant 0 : i32
    %c0_i32_0 = arith.constant 0 : i32
    %c0_i32_1 = arith.constant 0 : i32
    return %c0_i32, %c0_i32_0 : i32, i32
  }
  func.func @transform_4(%arg0: i32, %arg1: memref<2xi32, #tpu.memory_space<smem>>) -> (i32, i32) {
    %c0_i32 = arith.constant 0 : i32
    %c0_i32_0 = arith.constant 0 : i32
    %c0_i32_1 = arith.constant 0 : i32
    return %c0_i32, %c0_i32_0 : i32, i32
  }
  func.func @transform_5(%arg0: i32, %arg1: memref<2xi32, #tpu.memory_space<smem>>) -> (i32, i32) {
    %c0_i32 = arith.constant 0 : i32
    %c0_i32_0 = arith.constant 0 : i32
    %c0_i32_1 = arith.constant 0 : i32
    return %c0_i32, %c0_i32_0 : i32, i32
  }
  func.func @transform_6(%arg0: i32, %arg1: memref<2xi32, #tpu.memory_space<smem>>) -> (i32, i32) {
    %c0_i32 = arith.constant 0 : i32
    %c0_i32_0 = arith.constant 0 : i32
    %c0_i32_1 = arith.constant 0 : i32
    return %c0_i32, %c0_i32_0 : i32, i32
  }
  func.func @transform_7(%arg0: i32, %arg1: memref<2xi32, #tpu.memory_space<smem>>) -> (i32, i32) {
    %c0_i32 = arith.constant 0 : i32
    %c0_i32_0 = arith.constant 0 : i32
    %c0_i32_1 = arith.constant 0 : i32
    return %c0_i32, %c0_i32_0 : i32, i32
  }
  func.func @transform_8(%arg0: i32, %arg1: memref<2xi32, #tpu.memory_space<smem>>) -> (i32, i32, i32) {
    %c0_i32 = arith.constant 0 : i32
    %c0_i32_0 = arith.constant 0 : i32
    %c0_i32_1 = arith.constant 0 : i32
    return %arg0, %c0_i32, %c0_i32_0 : i32, i32, i32
  }
}

</mosaic_0001>

<bundles_post_ra>
// kernel: tpu_custom_call.1
= control target key start
LH: loop header
LB: loop body
LE: loop exit
PB: predicated region body
PF: predicated region fallthrough
CT: control target
= control target key end

     0   :  { %s2097_s0 = inlined_call_operand.hbm [shape: s32[2], index: 0, kind: input, shape index: {}]   ;;  %s2098_s1 = inlined_call_operand.hbm [shape: f32[2,8,32], index: 1, kind: input, shape index: {}]   ;;  %s2099_s2 = inlined_call_operand.hbm [shape: f32[2,8,32], index: 2, kind: input, shape index: {}]   ;;  %s2100_s3 = inlined_call_operand.hbm [shape: bf16[32,96], index: 3, kind: input, shape index: {}]   ;;  %s2101_s4 = inlined_call_operand.vmem [shape: f32[1,96], index: 4, kind: input, shape index: {}]   ;;  %s2102_s5 = inlined_call_operand.vmem [shape: bf16[32,32], index: 5, kind: input, shape index: {}]   ;;  %s2103_s6 = inlined_call_operand.vmem [shape: f32[1,32], index: 6, kind: input, shape index: {}]   ;;  %s2104_s7 = inlined_call_operand.vmem [shape: f32[1,32], index: 7, kind: input, shape index: {}]   ;;  %s2105_s8 = inlined_call_operand.vmem [shape: f32[1,32], index: 8, kind: input, shape index: {}]   ;;  %s2106_s9 = inlined_call_operand.hbm [shape: f32[2,8,32], index: 9, kind: output, shape index: {}]  }
   0x1   :  { %2115 = sst [smem:[#allocation21_spill]] %s2100_s3  ;;  %s1482_s11 = scalar_lea.hbm %s2097_s0, 16 }
   0x2   :  { %p1483_p0 = scmp.ne.s32.totalorder %s2097_s0, %s1482_s11  ;;  %p1486_p1 = scmp.lt.u32.totalorder %s1482_s11, %s2097_s0 }
   0x4   :  { %p1488_p2 = pnand %p1486_p1, %p1483_p0 }
   0x6   :  { %1491 = shalt.err (!%p1488_p2)  }
   0x7   :  { %s1658_s16 = smov [#allocation4]  }
   0x8   :  { %15 = dma.hbm_to_smem %s2097_s0, 16, %s1658_s16, [#allocation3] }
   0x9   :  { %1624 = dma.done.wait [#allocation3], 16 }
   0xa   :  { %1625 = vsyncadd [#allocation3], 4294967280 }
   0xb   :  { %17 = sfence }
   0xc   :  { %18 = vsyncpa [#allocation6], 0 }
   0xd   :  { %20 = vsyncpa [#allocation6 + $0x1], 0 }
   0xe   :  { %21 = vsyncpa [#allocation9], 0 }
   0xf   :  { %23 = vsyncpa [#allocation9 + $0x1], 0 }
  0x10   :  { %24 = vsyncpa [#allocation7], 0 }
  0x11   :  { %26 = vsyncpa [#allocation7 + $0x1], 0  ;;  %s1737_s19 = smov 0   ;;  %s1739_s20 = smov 0  }
  0x12   :  { %s1741_s21 = smov 0   ;;  %s1743_s22 = smov 0  }
  0x13 LB: > { %2116 = sst [smem:[#allocation17_spill]] %s1652_s21  ;;  %s1758_s0 = sadd.s32 4294967295, %s1656_s22   ;;  %s1656_s22 = sphi %s1743_s22, %s2138_s22   ;;  %s1652_s21 = sphi %s1741_s21, %s2143_s21   ;;  %s1648_s20 = sphi %s1739_s20, %s2142_s20   ;;  %s1644_s19 = sphi %s1737_s19, %s2141_s19  }
  0x14   : > { %s1240_s23 = sadd.s32 4294967294, %s1656_s22   ;;  %p52_p3 = scmp.ne.s32.totalorder %s1648_s20, %s1644_s19 }
  0x15   : > { %p2107_p4 = scmp.eq.s32.totalorder %s1758_s0, 0  ;;  %p234_p6 = scmp.eq.s32.totalorder %s1240_s23, 1 }
  0x16   : > { %p1241_p8 = scmp.ge.s32.totalorder %s1656_s22, 1  ;;  %p241_p10 = scmp.lt.s32.totalorder %s1656_s22, 3 }
  0x17   : > { %p1767_p7 = por %p2107_p4, %p52_p3  ;;  %p1772_p9 = por %p234_p6, %p52_p3 }
  0x18   : > { %p1777_p11 = pnand %p1241_p8, %p241_p10  ;;  %s1659_s27 = smov [#allocation10]  }
  0x19   : > { %s2117_s24 = scalar_select %p1767_p7, 1, 0 }
  0x1a   : > { %s2118_s25 = scalar_select %p1772_p9, 1, 0 }
  0x1b   : > { %s2120_s26 = scalar_select %p1777_p11, 1, 0 }
  0x1c   : > { %2119 = sst [smem:[#allocation18_spill]] %s2118_s25  ;;  %s253_s28 = sshll.u32 %s1659_s27, 4  ;;  %s1781_s28 = int_to_ptr.vmem [resolvable:$true] %s253_s28 }
  0x1d   : > { %p1395_p12 = pneg %p1777_p11  ;;  %s1793_s30 = sadd.s32 1, %s1656_s22  }
  0x1e   : > { %2122 = sst [smem:[#allocation19_spill]] %s1793_s30  ;;  %s39_s10 = sadd.s32 1, %s1652_s21 }
  0x1f   : > { %p1788_p0 = pnand %p1395_p12, %p2107_p4  ;;  %s36_s11 = ssub.s32 %s1656_s22, %s1793_s30 }
  0x20   : > { %s2123_s3 = sld [smem:[#allocation21_spill]] }
  0x21   : > { %p1494_p2 = pneg %p1788_p0 }
  0x26   : > { %s1492_s14 = scalar_lea.hbm %s2123_s3, 256 }
  0x27   : > { %p1493_p1 = scmp.ne.s32.totalorder %s2123_s3, %s1492_s14  ;;  %p1499_p8 = scmp.lt.u32.totalorder %s1492_s14, %s2123_s3 }
  0x29   : > { %p1495_p3 = pnand %p1494_p2, %p1493_p1 }
  0x2b   : > { %p1496_p6 = pneg %p1495_p3 }
  0x2d   : > { %p1501_p10 = pnand %p1499_p8, %p1496_p6 }
  0x2f   : > { %1504 = shalt.err (!%p1501_p10)
}
  0x30   : > { %s1505_s23 = scalar_lea.vmem %s1781_s28, 256  ;;  %p1513_p5 = scmp.lt.s32.totalorder %s1781_s28, %s1781_s28 }
  0x31   : > { %p1506_p12 = scmp.ne.s32.totalorder %s1781_s28, %s1505_s23  ;;  %p1514_p9 = scmp.lt.s32.totalorder %s1505_s23, %s1505_s23 }
  0x33   : > { %p1508_p13 = pnand %p1506_p12, %p1494_p2  ;;  %p1515_p7 = por %p1514_p9, %p1513_p5 }
  0x35   : > { %p1509_p4 = pneg %p1508_p13 }
  0x37   : > { %p1516_p11 = pnand %p1515_p7, %p1509_p4 }
  0x39   : > { %1519 = shalt.err (!%p1516_p11)
}
  0x3a   : > { %s1660_s27 = smov 64   ;;  %s1661_s12 = smov 4  }
  0x3b   : > { %1398 = dma.hbm_to_vmem [thread:$0]  (!%p1788_p0), %s2123_s3, 256, %s1781_s28, [#allocation9], %s1660_s27, %s1660_s27, %s1661_s12  }
  0x3c   : > { %p37_p5 = scmp.eq.s32.totalorder %s36_s11, 0  ;;  %p46_p4 = scmp.ne.s32.totalorder %s1652_s21, %s1648_s20 }
  0x3d   : > { %p47_p7 = scmp.eq.s32.totalorder %s1656_s22, 0  ;;  %p1411_p9 = scmp.lt.s32.totalorder %s1656_s22, 2 }
  0x3e   : > { %s1824_s15 = scalar_select %p37_p5, %s1652_s21, %s39_s10  }
  0x3f   : > { %p48_p11 = por %p47_p7, %p46_p4  ;;  %p2125_p13 = scmp.eq.s32.totalorder %s1758_s0, 1 }
  0x40   : > { %2124 = sst [smem:[#allocation20_spill]] %s1824_s15  ;;  %s282_s17 = sand.u32 1, %s1652_s21  }
  0x41   : > { %p1828_p1 = por %p2125_p13, %p46_p4  ;;  %s1245_s18 = sshll.u32 %s1656_s22, 7 }
  0x42   : > { %s1834_s23 = sshll.u32 %s282_s17, 3  ;;  %s1839_s28 = scalar_lea.hbm %s2098_s1, %s1245_s18 }
  0x43   : > { %s2126_s16 = scalar_select %p1828_p1, 1, 0 }
  0x44   : > { %s286_s10 = scalar_lea.vmem [#allocation5], %s1834_s23  ;;  %p1842_p0 = pnand %p1411_p9, %p48_p11 }
  0x45   : > { %s293_s11 = sshll.u32 %s286_s10, 4  ;;  %s1851_s30 = scalar_lea.hbm %s2099_s2, %s1245_s18  ;;  %s1846_s11 = int_to_ptr.vmem [resolvable:$true] %s293_s11 }
  0x46   : > { %s283_s14 = scalar_lea.sflag [#allocation6], %s282_s17  ;;  %s1520_s29 = scalar_lea.hbm %s1839_s28, 128 }
  0x47   : > { %p1521_p2 = scmp.ne.s32.totalorder %s1839_s28, %s1520_s29  ;;  %p1522_p3 = pneg %p1842_p0 }
  0x48   : > { %s1525_s15 = scalar_lea.hbm %s2098_s1, 256  ;;  %p1526_p10 = scmp.lt.u32.totalorder %s1839_s28, %s2098_s1 }
  0x49   : > { %p1523_p6 = pnand %p1522_p3, %p1521_p2  ;;  %p1527_p12 = scmp.lt.u32.totalorder %s1525_s15, %s1520_s29 }
  0x4a   : > { %p1529_p4 = scmp.lt.u32.totalorder %s1520_s29, %s1839_s28 }
  0x4b   : > { %p1524_p8 = pneg %p1523_p6  ;;  %p1528_p5 = por %p1527_p12, %p1526_p10 }
  0x4d   : > { %p1530_p7 = por %p1529_p4, %p1528_p5 }
  0x4f   : > { %p1531_p9 = pnand %p1530_p7, %p1524_p8 }
  0x51   : > { %1534 = shalt.err (!%p1531_p9)
}
  0x52   : > { %s1535_s17 = scalar_lea.vmem %s1846_s11, 128  ;;  %s1662_s3 = smov [#allocation5]  }
  0x53   : > { %p1536_p11 = scmp.ne.s32.totalorder %s1846_s11, %s1535_s17  ;;  %s1540_s18 = sshll.u32 %s1662_s3, 4  ;;  %s1541_s18 = int_to_ptr.vmem [resolvable:$false] %s1540_s18 }
  0x54   : > { %s1542_s21 = scalar_lea.vmem %s1541_s18, 256  ;;  %p1543_p6 = scmp.lt.s32.totalorder %s1846_s11, %s1541_s18 }
  0x55   : > { %p1538_p13 = pnand %p1536_p11, %p1522_p3  ;;  %p1544_p10 = scmp.lt.s32.totalorder %s1542_s21, %s1535_s17 }
  0x57   : > { %p1539_p2 = pneg %p1538_p13  ;;  %p1545_p12 = por %p1544_p10, %p1543_p6 }
  0x59   : > { %p1546_p5 = pnand %p1545_p12, %p1539_p2 }
  0x5b   : > { %1549 = shalt.err (!%p1546_p5)
}
  0x5c   : > { %1402 = dma.hbm_to_vmem [thread:$0]  (!%p1842_p0), %s1839_s28, 128, %s1846_s11, %s283_s14  }
  0x5d   : > { %s300_s25 = sand.u32 1, %s1656_s22   ;;  %s304_s15 = scalar_lea.vmem [#allocation8], %s1834_s23 }
  0x5e   : > { %s311_s12 = sshll.u32 %s304_s15, 4  ;;  %s301_s13 = scalar_lea.sflag [#allocation9], %s300_s25  ;;  %s312_s12 = int_to_ptr.vmem [resolvable:$true] %s311_s12 }
  0x5f   : > { %s1550_s29 = scalar_lea.hbm %s1851_s30, 128  ;;  %s1555_s3 = scalar_lea.hbm %s2099_s2, 256 }
  0x60   : > { %p1551_p8 = scmp.ne.s32.totalorder %s1851_s30, %s1550_s29  ;;  %p1556_p9 = scmp.lt.u32.totalorder %s1851_s30, %s2099_s2 }
  0x61   : > { %p1557_p11 = scmp.lt.u32.totalorder %s1555_s3, %s1550_s29  ;;  %p1559_p2 = scmp.lt.u32.totalorder %s1550_s29, %s1851_s30 }
  0x62   : > { %p1553_p4 = pnand %p1551_p8, %p1522_p3 }
  0x63   : > { %p1558_p13 = por %p1557_p11, %p1556_p9 }
  0x64   : > { %p1554_p7 = pneg %p1553_p4 }
  0x65   : > { %p1560_p6 = por %p1559_p2, %p1558_p13 }
  0x67   : > { %p1561_p10 = pnand %p1560_p6, %p1554_p7 }
  0x69   : > { %1564 = shalt.err (!%p1561_p10)
}
  0x6a   : > { %s1565_s23 = scalar_lea.vmem %s312_s12, 128  ;;  %s1663_s28 = smov [#allocation8]  }
  0x6b   : > { %p1566_p12 = scmp.ne.s32.totalorder %s312_s12, %s1565_s23  ;;  %s1570_s11 = sshll.u32 %s1663_s28, 4  ;;  %s1571_s11 = int_to_ptr.vmem [resolvable:$false] %s1570_s11 }
  0x6c   : > { %s1572_s14 = scalar_lea.vmem %s1571_s11, 256  ;;  %p1573_p4 = scmp.lt.s32.totalorder %s312_s12, %s1571_s11 }
  0x6d   : > { %p1568_p5 = pnand %p1566_p12, %p1522_p3  ;;  %p1574_p1 = scmp.lt.s32.totalorder %s1572_s14, %s1565_s23 }
  0x6f   : > { %p1569_p8 = pneg %p1568_p5  ;;  %p1575_p9 = por %p1574_p1, %p1573_p4 }
  0x71   : > { %p1576_p11 = pnand %p1575_p9, %p1569_p8 }
  0x73   : > { %1579 = shalt.err (!%p1576_p11)
}
  0x74   : > { %1405 = dma.hbm_to_vmem [thread:$0]  (!%p1842_p0), %s1851_s30, 128, %s312_s12, %s301_s13  }
  0x75   : > { %p2128_p7 = scmp.ne.s32.totalorder %s2120_s26, 0 }
  0x76   : > { %s1902_s25 = sand.u32 (!%p2128_p7), 1, %s1648_s20   ;;  %p2129_p1 = scmp.ne.s32.totalorder (!%p2128_p7), %s2117_s24, 0 }
  0x77   : > { %320 = sbr.rel (%p2128_p7) target bundleno = 2033 (0x7f1), region = 52  ;;  %s1905_s15 = sshll.u32 (!%p2128_p7), %s1902_s25, 3 }
  0x78   : > { %s323_s29 = scalar_lea.sflag (!%p2128_p7), [#allocation6], %s1902_s25  ;;  %s326_s10 = scalar_lea.vmem (!%p2128_p7), [#allocation5], %s1905_s15 }
  0x7e   : > { %1627 = dma.done.wait (%p2129_p1), %s323_s29, 128  }
  0x7f   : > { %1629 = vsyncadd (%p2129_p1), %s323_s29, 4294967168  ;;  %s331_s26 = sand.u32 1, %s1758_s0   ;;  %s335_s30 = scalar_lea.vmem [#allocation8], %s1905_s15 }
  0x80   : > { %s332_s27 = scalar_lea.sflag [#allocation9], %s331_s26 }
  0x81   : > { %1631 = dma.done.wait (%p2129_p1), %s332_s27, 128  }
  0x82   : > { %1633 = vsyncadd (%p2129_p1), %s332_s27, 4294967168  ;;  %p2130_p0 = scmp.eq.s32.totalorder %s1758_s0, 0 }
  0x84   : > { %1635 = dma.done.wait (%p2130_p0), [#allocation9], 256   ;;  %p2131_p3 = pmov %p2130_p0 }
  0x85   : > { %v1664_v0 = vmov 0.0   ;;  %vm1665_vm0 = vmmov 0   ;;  %v1460_v1 = vld [vmem:[#allocation10] sm:$0xff]   ;;  %s1666_s24 = smov 96   ;;  %v1461_v2 = vld [vmem:[#allocation10 + $0x8] sm:$0xff]   ;;  %vm404_vm1 = vcmask 261120   ;;  %v554_v35 = vlaneseq }
  0x86   : > { %1637 = vsyncadd (%p2131_p3), [#allocation9], 4294967040  ;;  %1305 = vmatprep.subr.bf16.mxu0 %v1664_v0  ;;  %1313 = vmatprep.subr.bf16.mxu1 %v1664_v0  ;;  %v1929_v3 = vld [vmem:[%s326_s10] sm:$0xff]  ;;  %v379_v7 = vld [vmem:[%s335_s30] sm:$0xff]  ;;  %s1667_s17 = smov 120   ;;  %s1668_s3 = smov 112  }
  0x87   : > { %1309 = vmatprep.mubr.msk.bf16.mxu0 %vm1665_vm0, %v1664_v0  ;;  %1317 = vmatprep.mubr.msk.bf16.mxu1 %vm1665_vm0, %v1664_v0  ;;  %v1934_v4 = vld [vmem:[%s2101_s4] ss:$0 sm:$0xff]  ;;  %v380_v5 = vpack.c.bf16 %v1929_v3, %v1929_v3  ;;  %v448_v9 = vpack.c.bf16 %v379_v7, %v379_v7  ;;  %s1669_s18 = smov 104   ;;  %vm558_vm2 = vcmask 64512   ;;  %s1670_s21 = smov 64   ;;  %v555_v36 = vand.u32 127, %v554_v35 }
  0x88   : > { %449 = vrot.lane.b32.xlu0 %v1460_v1, %s1666_s24  ;;  %1306 = vmatpush3.bf16.msra.mxu0 %v1460_v1  ;;  %s553_s23 = sld [smem:[#allocation4 + %s1758_s0]]  ;;  %vm622_vm4 = vcmask 1043456   ;;  %s1671_s28 = smov 8   ;;  %vm786_vm5 = vcmask 130112   ;;  %vm904_vm6 = vcmask 195712   ;;  %vm1022_vm7 = vcmask 261312  }
  0x89   : > { %1307 = vmatprep.subr.bf16.mxu0 %v1664_v0  ;;  %455 = vrot.lane.b32.xlu1 %v1934_v4, %s1666_s24  ;;  %s1672_s26 = smov 16   ;;  %s1673_s27 = smov 24  }
  0x8a   : > { %s1125_s29 = scalar_lea.sflag [#allocation7], %s1902_s25  ;;  %p2134_p2 = scmp.ne.s32.totalorder %s2126_s16, 0 }
  0x8c   : > { %451 = vrot.lane.b32.xlu0 %v1461_v2, %s1666_s24  ;;  %1308 = vmatpush3.bf16.msra.mxu0 %v1461_v2 }
  0x8d   : > { %1321 = vmatprep.subr.bf16.mxu0 %v1664_v0 }
  0x8e   : > { %v556_v37 = vstv %s553_s23 }
  0x8f   : > { %1310 = vmatmul.mubr.msk.bf16.vlgmr.msra.gmra.mrb[0].mxu0 %vm404_vm1, %v380_v5  ;;  %vm1984_vm3 = vcmp.ge.s32.totalorder %v555_v36, %v556_v37 }
  0x90   : > { %1325 = vmatprep.mubr.msk.bf16.mxu0 %vm1665_vm0, %v1664_v0 }
  0xfa   : > { %v450_v6 = vpop.permute.xlu0 %449 }
  0xfb   : > { %1314 = vmatpush3.bf16.msra.mxu1 %v450_v6  ;;  %v456_v16 = vpop.permute.xlu1 %455 }
  0xfc   : > { %1315 = vmatprep.subr.bf16.mxu1 %v1664_v0 }
  0xfe   : > { %v452_v8 = vpop.permute.xlu0 %451 }
  0xff   : > { %1316 = vmatpush3.bf16.msra.mxu1 %v452_v8 }
 0x100   : > { %1329 = vmatprep.subr.bf16.mxu1 %v1664_v0 }
 0x102   : > { %1318 = vmatmul.mubr.msk.bf16.vlgmr.msra.gmra.mrb[0].mxu1 %vm404_vm1, %v448_v9 }
 0x103   : > { %1331 = vmatprep.mubr.msk.bf16.mxu1 %vm1665_vm0, %v1664_v0 }
 0x162   : > { %v442_v10 = vpop.f32.mrb[0].mxu0 }
 0x163   : > { %v443_v11 = vadd.f32 %v1934_v4, %v442_v10  ;;  %v1311_v12 = vpop.f32.mrb[1].mxu0 }
 0x164   : > { %v445_v13 = vpop.f32.mrb[2].mxu0 }
 0x165   : > { %v550_v14 = vpack.c.bf16 %v443_v11, %v443_v11  ;;  %v1312_v15 = vpop.f32.mrb[3].mxu0 }
 0x167   : > { %668 = vrot.lane.b32.xlu0 %v550_v14, %s1667_s17 }
 0x16b   : > { %788 = vrot.lane.b32.xlu0 %v550_v14, %s1668_s3 }
 0x16f   : > { %906 = vrot.lane.b32.xlu0 %v550_v14, %s1669_s18 }
 0x173   : > { %503 = vrot.lane.b32.xlu0 %v1461_v2, %s1670_s21 }
 0x1d5   : > { %v495_v17 = vpop.f32.mrb[0].mxu1 }
 0x1d6   : > { %v496_v18 = vadd.f32 %v495_v17, %v456_v16  ;;  %v1319_v19 = vpop.f32.mrb[1].mxu1 }
 0x1d7   : > { %v498_v20 = vpop.f32.mrb[2].mxu1 }
 0x1d8   : > { %v551_v21 = vpack.c.bf16 %v496_v18, %v496_v18  ;;  %v1320_v22 = vpop.f32.mrb[3].mxu1 }
 0x1d9   : > { %v669_v24 = vpop.permute.xlu0 %668 }
 0x1da   : > { %671 = vrot.lane.b32.xlu1 %v551_v21, %s1667_s17  ;;  %v563_v23 = vsel %vm558_vm2, %v551_v21, 0 }
 0x1db   : > { %1330 = vmatpush3.bf16.xpose.msra.mxu1 %v563_v23 }
 0x1dc   : > { %1341 = vmatprep.subr.bf16.mxu1 %v1664_v0 }
 0x1dd   : > { %v789_v28 = vpop.permute.xlu0 %788 }
 0x1de   : > { %790 = vrot.lane.b32.xlu1 %v551_v21, %s1668_s3 }
 0x1e1   : > { %v907_v31 = vpop.permute.xlu0 %906 }
 0x1e2   : > { %908 = vrot.lane.b32.xlu1 %v551_v21, %s1669_s18  ;;  %1332 = vmatmul.mubr.msk.bf16.vlgmr.msra.gmra.mrb[4].mxu1 %vm558_vm2, %v550_v14 }
 0x1e3   : > { %1343 = vmatprep.mubr.msk.bf16.mxu1 %vm1665_vm0, %v1664_v0 }
 0x1e5   : > { %v504_v33 = vpop.permute.xlu0 %503 }
 0x1e6   : > { %501 = vrot.lane.b32.xlu1 %v1460_v1, %s1670_s21 }
 0x24c   : > { %v672_v25 = vpop.permute.xlu1 %671 }
 0x24d   : > { %v677_v26 = vsel %vm558_vm2, %v672_v25, 0 }
 0x24e   : > { %1342 = vmatpush3.bf16.xpose.msra.mxu1 %v677_v26 }
 0x24f   : > { %1353 = vmatprep.subr.bf16.mxu1 %v1664_v0 }
 0x250   : > { %v791_v27 = vpop.permute.xlu1 %790 }
 0x251   : > { %v796_v30 = vsel %vm558_vm2, %v791_v27, 0 }
 0x254   : > { %v909_v29 = vpop.permute.xlu1 %908 }
 0x255   : > { %1344 = vmatmul.mubr.msk.bf16.vlgmr.msra.gmra.mrb[8].mxu1 %vm558_vm2, %v669_v24  ;;  %v914_v34 = vsel %vm558_vm2, %v909_v29, 0 }
 0x256   : > { %1354 = vmatpush3.bf16.xpose.msra.mxu1 %v796_v30  ;;  %1355 = vmatprep.mubr.msk.bf16.mxu1 %vm1665_vm0, %v1664_v0 }
 0x257   : > { %1365 = vmatprep.subr.bf16.mxu1 %v1664_v0 }
 0x258   : > { %v502_v32 = vpop.permute.xlu1 %501 }
 0x259   : > { %1322 = vmatpush3.bf16.msra.mxu0 %v502_v32 }
 0x25a   : > { %1323 = vmatprep.subr.bf16.mxu0 %v1664_v0 }
 0x25d   : > { %1356 = vmatmul.mubr.msk.bf16.vlgmr.msra.gmra.mrb[12].mxu1 %vm558_vm2, %v789_v28  ;;  %1324 = vmatpush3.bf16.msra.mxu0 %v504_v33 }
 0x25e   : > { %1366 = vmatpush3.bf16.xpose.msra.mxu1 %v914_v34  ;;  %1367 = vmatprep.mubr.msk.bf16.mxu1 %vm1665_vm0, %v1664_v0 }
 0x25f   : > { %1335 = vmatprep.subr.bf16.mxu0 %v1664_v0  ;;  %1377 = vmatprep.subr.bf16.mxu1 %v1664_v0 }
 0x260   : > { %1326 = vmatmul.mubr.msk.bf16.vlgmr.msra.gmra.mrb[4].mxu0 %vm404_vm1, %v448_v9 }
 0x261   : > { %1337 = vmatprep.mubr.msk.bf16.mxu0 %vm1665_vm0, %v1664_v0 }
 0x265   : > { %1368 = vmatmul.mubr.msk.bf16.vlgmr.msra.gmra.mrb[16].mxu1 %vm558_vm2, %v907_v31 }
 0x266   : > { %1381 = vmatprep.mubr.msk.bf16.mxu1 %vm1665_vm0, %v1664_v0 }
 0x2b5   : > { %v599_v38 = vpop.f32.mrb[4].mxu1 }
 0x2b6   : > { %v605_v40 = vmul.f32 0.35355338, %v599_v38  ;;  %v1333_v41 = vpop.f32.mrb[5].mxu1 }
 0x2b7   : > { %v602_v42 = vpop.f32.mrb[6].mxu1 }
 0x2b8   : > { %v1334_v43 = vpop.f32.mrb[7].mxu1  ;;  %v606_v44 = vsel %vm1984_vm3, -1000000.0, %v605_v40 }
 0x2b9   : > { %v607_v45 = vsel %vm558_vm2, %v606_v44, -inf }
 0x2ba   : > { %608 = vmax.xlane.f32.xlu1 %v607_v45 }
 0x328   : > { %v713_v46 = vpop.f32.mrb[8].mxu1 }
 0x329   : > { %v719_v47 = vmul.f32 0.35355338, %v713_v46  ;;  %v1345_v48 = vpop.f32.mrb[9].mxu1 }
 0x32a   : > { %v716_v49 = vpop.f32.mrb[10].mxu1 }
 0x32b   : > { %v1346_v50 = vpop.f32.mrb[11].mxu1  ;;  %v720_v51 = vsel %vm1984_vm3, -1000000.0, %v719_v47 }
 0x32c   : > { %v721_v52 = vsel %vm558_vm2, %v720_v51, -inf }
 0x32d   : > { %722 = vmax.xlane.f32.xlu0 %v721_v52 }
 0x330   : > { %v832_v53 = vpop.f32.mrb[12].mxu1 }
 0x331   : > { %v838_v54 = vmul.f32 0.35355338, %v832_v53  ;;  %v1357_v55 = vpop.f32.mrb[13].mxu1 }
 0x332   : > { %v835_v56 = vpop.f32.mrb[14].mxu1 }
 0x333   : > { %v1358_v57 = vpop.f32.mrb[15].mxu1  ;;  %v839_v58 = vsel %vm1984_vm3, -1000000.0, %v838_v54  ;;  %v544_v11 = vpop.f32.mrb[4].mxu0 }
 0x334   : > { %v840_v59 = vsel %vm558_vm2, %v839_v58, -inf  ;;  %v1327_v12 = vpop.f32.mrb[5].mxu0 }
 0x335   : > { %841 = vmax.xlane.f32.xlu0 %v840_v59  ;;  %v547_v13 = vpop.f32.mrb[6].mxu0 }
 0x336   : > { %v1328_v14 = vpop.f32.mrb[7].mxu0 }
 0x338   : > { %v950_v60 = vpop.f32.mrb[16].mxu1 }
 0x339   : > { %v956_v61 = vmul.f32 0.35355338, %v950_v60  ;;  %v1369_v62 = vpop.f32.mrb[17].mxu1 }
 0x33a   : > { %v953_v63 = vpop.f32.mrb[18].mxu1 }
 0x33b   : > { %v1370_v1 = vpop.f32.mrb[19].mxu1  ;;  %v957_v2 = vsel %vm1984_vm3, -1000000.0, %v956_v61  ;;  %v1462_v63 = vld [vmem:[%s2102_s5] sm:$0xff]  }
 0x33c   : > { %v958_v5 = vsel %vm558_vm2, %v957_v2, -inf  ;;  %1378 = vmatpush3.bf16.msra.mxu1 %v1462_v63  ;;  %v1463_v1 = vld [vmem:[%s2102_s5 + $0x8] sm:$0xff]  }
 0x33d   : > { %959 = vmax.xlane.f32.xlu1 %v958_v5  ;;  %1379 = vmatprep.subr.bf16.mxu1 %v1664_v0 }
 0x340   : > { %1380 = vmatpush3.bf16.msra.mxu1 %v1463_v1 }
 0x347   : > { %v609_v6 = vpop.xlane.xlu1 %608 }
 0x348   : > { %v610_v7 = vsub.f32 %v606_v44, %v609_v6 }
 0x34a   : > { %v611_v8 = vmul.f32 1.442695, %v610_v7 }
 0x34b   : > { %507 = vrot.lane.b32.xlu0 %v1934_v4, %s1670_s21  ;;  %s376_s21 = scalar_lea.vmem [#allocation11], %s1905_s15 }
 0x34c   : > { %1464 = vpow2.f32 %v611_v8  ;;  %s1138_s23 = sshll.u32 %s376_s21, 4  ;;  %s2054_s23 = int_to_ptr.vmem [resolvable:$true] %s1138_s23 }
 0x34d   : > { %s1580_s10 = scalar_lea.vmem %s2054_s23, 128 }
 0x34e   : > { %p1581_p13 = scmp.ne.s32.totalorder %s2054_s23, %s1580_s10 }
 0x350   : > { %p1582_p6 = pnand %p1581_p13, %p2134_p2 }
 0x352   : > { %p1583_p10 = pneg %p1582_p6 }
 0x356   : > { %v1465_v9 = vpop.eup %1464 }
 0x357   : > { %v613_v10 = vsel %vm558_vm2, %v1465_v9, 0.0 }
 0x358   : > { %614 = vadd.xlane.f32.xlu1 %v613_v10 }
 0x3ba   : > { %v723_v15 = vpop.xlane.xlu0 %722 }
 0x3bb   : > { %v724_v16 = vsub.f32 %v720_v51, %v723_v15 }
 0x3bd   : > { %v725_v17 = vmul.f32 1.442695, %v724_v16  ;;  %v1267_v16 = vld [vmem:[%s2103_s6] ss:$0 sm:$0xff] }
 0x3bf   : > { %1466 = vpow2.f32 %v725_v17 }
 0x3c2   : > { %v842_v18 = vpop.xlane.xlu0 %841 }
 0x3c3   : > { %v843_v19 = vsub.f32 %v839_v58, %v842_v18 }
 0x3c5   : > { %v844_v20 = vmul.f32 1.442695, %v843_v19 }
 0x3c6   : > { %v508_v21 = vpop.permute.xlu0 %507 }
 0x3c7   : > { %1468 = vpow2.f32 %v844_v20  ;;  %v545_v22 = vadd.f32 %v544_v11, %v508_v21 }
 0x3c9   : > { %v1467_v4 = vpop.eup %1466  ;;  %v552_v23 = vpack.c.bf16 %v545_v22, %v545_v22 }
 0x3ca   : > { %v960_v24 = vpop.xlane.xlu1 %959  ;;  %v727_v25 = vsel %vm558_vm2, %v1467_v4, 0.0 }
 0x3cb   : > { %v961_v26 = vsub.f32 %v957_v2, %v960_v24  ;;  %728 = vadd.xlane.f32.xlu1 %v727_v25  ;;  %v624_v27 = vsel %vm622_vm4, %v552_v23, 0  ;;  %852 = vrot.lane.b32.xlu0 %v552_v23, %s1668_s3 }
 0x3cc   : > { %1336 = vmatpush3.bf16.msra.mxu0 %v624_v27 }
 0x3cd   : > { %v962_v28 = vmul.f32 1.442695, %v961_v26  ;;  %1347 = vmatprep.subr.bf16.mxu0 %v1664_v0 }
 0x3cf   : > { %1470 = vpow2.f32 %v962_v28  ;;  %970 = vrot.lane.b32.xlu0 %v552_v23, %s1669_s18  ;;  %s1274_s18 = sshll.u32 %s1758_s0, 7  ;;  %s1674_s0 = smov [#allocation11]  }
 0x3d0   : > { %s2052_s14 = scalar_lea.hbm %s2106_s9, %s1274_s18  ;;  %s1584_s15 = sshll.u32 %s1674_s0, 4  ;;  %s1585_s15 = int_to_ptr.vmem [resolvable:$false] %s1584_s15 }
 0x3d1   : > { %v1469_v29 = vpop.eup %1468  ;;  %p1587_p12 = scmp.lt.s32.totalorder %s2054_s23, %s1585_s15 }
 0x3d2   : > { %v846_v30 = vsel %vm558_vm2, %v1469_v29, 0.0 }
 0x3d3   : > { %847 = vadd.xlane.f32.xlu1 %v846_v30 }
 0x3d9   : > { %v1471_v31 = vpop.eup %1470 }
 0x3da   : > { %v964_v32 = vsel %vm558_vm2, %v1471_v31, 0.0 }
 0x3db   : > { %965 = vadd.xlane.f32.xlu1 %v964_v32 }
 0x3e5   : > { %v615_v33 = vpop.xlane.xlu1 %614 }
 0x3e6   : > { %1472 = vrcp.f32 %v615_v33  ;;  %v1272_v33 = vld [vmem:[%s2105_s8] ss:$0 sm:$0xff] }
 0x3ec   : > { %734 = vrot.lane.b32.xlu1 %v552_v23, %s1667_s17 }
 0x3f0   : > { %v1473_v34 = vpop.eup %1472 }
 0x3f1   : > { %v617_v35 = vmul.f32 %v1473_v34, %v1465_v9 }
 0x3f3   : > { %v618_v36 = vpack.c.bf16 %v617_v35, %v617_v35 }
 0x3f5   : > { %1338 = vmatmul.mubr.msk.bf16.vlgmr.msra.gmra.mrb[8].mxu0 %vm558_vm2, %v618_v36 }
 0x3f6   : > { %1349 = vmatprep.mubr.msk.bf16.mxu0 %vm1665_vm0, %v1664_v0 }
 0x43d   : > { %v853_v46 = vpop.permute.xlu0 %852 }
 0x43e   : > { %v858_v47 = vsel %vm622_vm4, %v853_v46, 0 }
 0x441   : > { %v971_v49 = vpop.permute.xlu0 %970 }
 0x442   : > { %v976_v52 = vsel %vm622_vm4, %v971_v49, 0 }
 0x458   : > { %v729_v37 = vpop.xlane.xlu1 %728 }
 0x459   : > { %1474 = vrcp.f32 %v729_v37 }
 0x460   : > { %v848_v38 = vpop.xlane.xlu1 %847 }
 0x461   : > { %1476 = vrcp.f32 %v848_v38 }
 0x463   : > { %v1475_v39 = vpop.eup %1474 }
 0x464   : > { %v731_v41 = vmul.f32 %v1475_v39, %v1467_v4 }
 0x466   : > { %v732_v44 = vpack.c.bf16 %v731_v41, %v731_v41 }
 0x468   : > { %v966_v40 = vpop.xlane.xlu1 %965 }
 0x469   : > { %1478 = vrcp.f32 %v966_v40 }
 0x46b   : > { %v1477_v45 = vpop.eup %1476 }
 0x46c   : > { %v735_v42 = vpop.permute.xlu1 %734  ;;  %v850_v48 = vmul.f32 %v1477_v45, %v1469_v29 }
 0x46d   : > { %v740_v43 = vsel %vm622_vm4, %v735_v42, 0 }
 0x46e   : > { %1348 = vmatpush3.bf16.msra.mxu0 %v740_v43  ;;  %v851_v50 = vpack.c.bf16 %v850_v48, %v850_v48 }
 0x46f   : > { %1359 = vmatprep.subr.bf16.mxu0 %v1664_v0 }
 0x471   : > { %1350 = vmatmul.mubr.msk.bf16.vlgmr.msra.gmra.mrb[12].mxu0 %vm558_vm2, %v732_v44 }
 0x472   : > { %1360 = vmatpush3.bf16.msra.mxu0 %v858_v47  ;;  %1361 = vmatprep.mubr.msk.bf16.mxu0 %vm1665_vm0, %v1664_v0 }
 0x473   : > { %1371 = vmatprep.subr.bf16.mxu0 %v1664_v0  ;;  %v1479_v51 = vpop.eup %1478 }
 0x474   : > { %v968_v53 = vmul.f32 %v1479_v51, %v1471_v31 }
 0x476   : > { %v969_v54 = vpack.c.bf16 %v968_v53, %v968_v53 }
 0x479   : > { %1362 = vmatmul.mubr.msk.bf16.vlgmr.msra.gmra.mrb[16].mxu0 %vm558_vm2, %v851_v50 }
 0x47a   : > { %1372 = vmatpush3.bf16.msra.mxu0 %v976_v52  ;;  %1373 = vmatprep.mubr.msk.bf16.mxu0 %vm1665_vm0, %v1664_v0 }
 0x481   : > { %1374 = vmatmul.mubr.msk.bf16.vlgmr.msra.gmra.mrb[20].mxu0 %vm558_vm2, %v969_v54 }
 0x4c8   : > { %v660_v55 = vpop.f32.mrb[8].mxu0 }
 0x4c9   : > { %666 = vst.msk [vmem:[#allocation2] sm:$0xff] %vm558_vm2, %v660_v55  ;;  %v1339_v56 = vpop.f32.mrb[9].mxu0 }
 0x4ca   : > { %v663_v57 = vpop.f32.mrb[10].mxu0 }
 0x4cb   : > { %v1340_v58 = vpop.f32.mrb[11].mxu0 }
 0x544   : > { %v776_v59 = vpop.f32.mrb[12].mxu0 }
 0x545   : > { %783 = vrot.lane.b32.xlu0 %v776_v59, %s1671_s28  ;;  %v1351_v60 = vpop.f32.mrb[13].mxu0 }
 0x546   : > { %v779_v61 = vpop.f32.mrb[14].mxu0 }
 0x547   : > { %v1352_v62 = vpop.f32.mrb[15].mxu0 }
 0x54c   : > { %v894_v2 = vpop.f32.mrb[16].mxu0 }
 0x54d   : > { %901 = vrot.lane.b32.xlu0 %v894_v2, %s1672_s26  ;;  %v1363_v5 = vpop.f32.mrb[17].mxu0  ;;  %s1586_s26 = scalar_lea.vmem %s1585_s15, 256 }
 0x54e   : > { %v897_v6 = vpop.f32.mrb[18].mxu0  ;;  %p1588_p5 = scmp.lt.s32.totalorder %s1586_s26, %s1580_s10 }
 0x54f   : > { %v1364_v7 = vpop.f32.mrb[19].mxu0 }
 0x550   : > { %p1589_p8 = por %p1588_p5, %p1587_p12 }
 0x552   : > { %p1590_p4 = pnand %p1589_p8, %p1583_p10 }
 0x554   : > { %v1012_v8 = vpop.f32.mrb[20].mxu0 }
 0x555   : > { %1019 = vrot.lane.b32.xlu1 %v1012_v8, %s1673_s27  ;;  %v1375_v9 = vpop.f32.mrb[21].mxu0 }
 0x556   : > { %v1015_v10 = vpop.f32.mrb[22].mxu0 }
 0x557   : > { %v1376_v11 = vpop.f32.mrb[23].mxu0 }
 0x5b7   : > { %v784_v12 = vpop.permute.xlu0 %783 }
 0x5b8   : > { %787 = vst.msk [vmem:[#allocation2] sm:$0xff] %vm786_vm5, %v784_v12 }
 0x5bf   : > { %v902_v13 = vpop.permute.xlu0 %901 }
 0x5c0   : > { %905 = vst.msk [vmem:[#allocation2] sm:$0xff] %vm904_vm6, %v902_v13 }
 0x5c7   : > { %v1020_v0 = vpop.permute.xlu1 %1019 }
 0x5c8   : > { %1023 = vst.msk [vmem:[#allocation2] sm:$0xff] %vm1022_vm7, %v1020_v0 }
 0x5cf   : > { %v1024_v14 = vld [vmem:[#allocation2] sm:$0xff] }
 0x5d0   : > { %v1025_v15 = vpack.c.bf16 %v1024_v14, %v1024_v14 }
 0x5d2   : > { %1382 = vmatmul.mubr.msk.bf16.vlgmr.msra.gmra.mrb[20].mxu1 %vm404_vm1, %v1025_v15 }
 0x6a5   : > { %v1086_v17 = vpop.f32.mrb[20].mxu1 }
 0x6a6   : > { %v1087_v18 = vadd.f32 %v1267_v16, %v1086_v17  ;;  %v1383_v19 = vpop.f32.mrb[21].mxu1 }
 0x6a7   : > { %v1089_v20 = vpop.f32.mrb[22].mxu1 }
 0x6a8   : > { %v1384_v21 = vpop.f32.mrb[23].mxu1  ;;  %v1092_v22 = vadd.f32 %v1087_v18, %v1929_v3  ;;  %v1271_v3 = vld [vmem:[%s2104_s7] ss:$0 sm:$0xff] }
 0x6aa   : > { %v1093_v4 = vsel %vm404_vm1, %v1092_v22, 0.0 }
 0x6ab   : > { %1094 = vadd.xlane.f32.xlu0 %v1093_v4 }
 0x738   : > { %v1095_v23 = vpop.xlane.xlu0 %1094 }
 0x739   : > { %v1097_v24 = vmul.f32 0.03125, %v1095_v23 }
 0x73b   : > { %v1098_v25 = vsub.f32 %v1092_v22, %v1097_v24 }
 0x73d   : > { %v1099_v26 = vmul.f32 %v1098_v25, %v1098_v25 }
 0x73f   : > { %v1100_v27 = vsel %vm404_vm1, %v1099_v26, 0.0 }
 0x740   : > { %1101 = vadd.xlane.f32.xlu1 %v1100_v27 }
 0x7cd   : > { %v1102_v28 = vpop.xlane.xlu1 %1101 }
 0x7ce   : > { %v1103_v29 = vmul.f32 0.03125, %v1102_v28 }
 0x7d0   : > { %v1104_v30 = vadd.f32 1e-05, %v1103_v29 }
 0x7d2   : > { %1480 = vrsqrt.f32 %v1104_v30 }
 0x7dc   : > { %v1481_v31 = vpop.eup %1480 }
 0x7dd   : > { %v1106_v32 = vmul.f32 %v1481_v31, %v1098_v25 }
 0x7df   : > { %v1114_v34 = vmul.f32 %v1271_v3, %v1106_v32 }
 0x7e1   : > { %v1122_v35 = vadd.f32 %v1272_v33, %v1114_v34 }
 0x7e3   : > { %1123 = vst.msk [vmem:[%s376_s21] sm:$0xff] %vm404_vm1, %v1122_v35 }
 0x7e4   : > { %1593 = shalt.err (!%p1590_p4)
}
 0x7e5   : > { %s1594_s25 = scalar_lea.hbm %s2052_s14, 128  ;;  %s1598_s24 = scalar_lea.hbm %s2106_s9, 256 }
 0x7e6   : > { %p1595_p9 = scmp.ne.s32.totalorder %s2052_s14, %s1594_s25  ;;  %p1599_p1 = scmp.lt.u32.totalorder %s2052_s14, %s2106_s9 }
 0x7e7   : > { %p1600_p0 = scmp.lt.u32.totalorder %s1598_s24, %s1594_s25  ;;  %p1602_p13 = scmp.lt.u32.totalorder %s1594_s25, %s2052_s14 }
 0x7e8   : > { %p1596_p11 = pnand %p1595_p9, %p2134_p2 }
 0x7e9   : > { %p1601_p3 = por %p1600_p0, %p1599_p1 }
 0x7ea   : > { %p1597_p7 = pneg %p1596_p11 }
 0x7eb   : > { %p1603_p6 = por %p1602_p13, %p1601_p3 }
 0x7ed   : > { %p1604_p10 = pnand %p1603_p6, %p1597_p7 }
 0x7ef   : > { %1607 = shalt.err (!%p1604_p10)
}
 0x7f0   : > { %1393 = dma.vmem_to_hbm [thread:$0]  (%p2134_p2), %s2054_s23, 128, %s2052_s14, %s1125_s29  }
 0x7f1 PF: > { %s2135_s17 = sld [smem:[#allocation18_spill]]  ;;  %s1150_s3 = sand.u32 1, %s1644_s19  }
 0x7f2   : > { %p2137_p5 = scmp.ge.s32.totalorder %s1656_s22, 2  ;;  %s1151_s18 = scalar_lea.sflag [#allocation7], %s1150_s3 }
 0x7f7   : > { %p2136_p12 = scmp.ne.s32.totalorder %s2135_s17, 0 }
 0x7f9   : > { %p1407_p8 = pnand %p2137_p5, %p2136_p12 }
 0x7fb   : > { %1639 = dma.done.wait (!%p1407_p8), %s1151_s18, 128  }
 0x7fc   : > { %1641 = vsyncadd (!%p1407_p8), %s1151_s18, 4294967168  ;;  %s2138_s22 = sld [smem:[#allocation19_spill]]  ;;  %s2139_s21 = sld [smem:[#allocation17_spill]] }
 0x7fd   : > { %s2140_s28 = sld [smem:[#allocation20_spill]]  ;;  %s2141_s19 = smov %s1648_s20 }
 0x802   : > { %p29_p4 = scmp.ge.s32.totalorder %s2138_s22, 4   ;;  %s2142_s20 = smov %s2139_s21 }
 0x803   : > { %s2143_s21 = smov %s2140_s28 }
 0x804   :  { %31 = sbr.rel (!%p29_p4) target bundleno = 19 (0x13), region = 114 }
 0x80b   :  { %1156 = vsyncpa [#allocation6], 1 }
 0x80c   :  { %1158 = vsyncpa [#allocation6 + $0x1], 1 }
 0x80d   :  { %1159 = vsyncpa [#allocation9], 1 }
 0x80e   :  { %1161 = vsyncpa [#allocation9 + $0x1], 1 }
 0x80f   :  { %1162 = vsyncpa [#allocation7], 1 }
 0x810   :  { %1164 = vsyncpa [#allocation7 + $0x1], 1 }

</bundles_post_ra>
